<compile_context>
chip_gen: v7x
topology: tpu7x:2x2x1
jax: 0.10.0
libtpu: 0.0.40
codegen_flags: <defaults>
</compile_context>

<pallas_src>
from functools import partial

import numpy as np
import jax
import jax.numpy as jnp
from jax.experimental import pallas as pl
from jax.experimental.pallas import tpu as pltpu


# ----------------------------- Pallas kernels ------------------------------ #

def _somgrid_noacc_kernel(x_ref, wt_ref, o_ref):
    # K fully resident (single contraction block): no scratch accumulator.
    o_ref[...] = jnp.dot(x_ref[...], wt_ref[...],
                         preferred_element_type=jnp.float32).astype(o_ref.dtype)


def _somgrid_acc_kernel(x_ref, wt_ref, o_ref, acc_ref):
    # grid = (M tiles, N tiles, kb); K (last axis) is the reduction sweep.
    @pl.when(pl.program_id(2) == 0)
    def _():
        acc_ref[...] = jnp.zeros_like(acc_ref)

    acc_ref[...] += jnp.dot(x_ref[...], wt_ref[...],
                            preferred_element_type=jnp.float32)

    @pl.when(pl.program_id(2) == pl.num_programs(2) - 1)
    def _():
        o_ref[...] = acc_ref[...].astype(o_ref.dtype)


@partial(jax.jit, static_argnames=("tm", "tn", "tk", "kb", "band",
                                   "out_dtype", "vmem_limit"))
def somgrid_blur(x, w_t, *, tm, tn, tk, kb, band, out_dtype, vmem_limit):
    """out = x @ w_t (band-structure aware).  x: (m_pad, s_pad), w_t: (s_pad, s_pad)."""
    m_pad, s_pad = x.shape
    assert w_t.shape == (s_pad, s_pad)
    assert m_pad % tm == 0 and s_pad % tn == 0 and s_pad % tk == 0
    m_tiles, n_tiles, k_tiles = m_pad // tm, s_pad // tn, s_pad // tk

    if kb == 1:
        # K resident (tk == s_pad).  j-outer grid: each W_T column block is
        # fetched from HBM exactly once (constant index across the inner i sweep).
        assert k_tiles == 1
        return pl.pallas_call(
            _somgrid_noacc_kernel,
            out_shape=jax.ShapeDtypeStruct((m_pad, s_pad), out_dtype),
            grid_spec=pltpu.PrefetchScalarGridSpec(
                num_scalar_prefetch=0,
                grid=(n_tiles, m_tiles),
                in_specs=[pl.BlockSpec((tm, tk), lambda j, i: (i, 0)),
                          pl.BlockSpec((tk, tn), lambda j, i: (0, j))],
                out_specs=pl.BlockSpec((tm, tn), lambda j, i: (i, j)),
            ),
            compiler_params=pltpu.CompilerParams(
                dimension_semantics=("parallel", "parallel"),
                vmem_limit_bytes=vmem_limit),
        )(x, w_t)

    # Banded accumulation path.  For output tile j only K blocks
    # [k_start(j), k_start(j)+kb) can hold nonzero W_T entries; k_start is
    # clamped so the kb visited blocks are distinct, in range, and cover the
    # band -> no double accumulation and no masking required (extra edge
    # blocks only contribute zeros).
    def k_block(j, k):
        ks = jnp.maximum(j * tn - band, 0) // tk
        ks = jnp.minimum(ks, k_tiles - kb)
        return ks + k

    return pl.pallas_call(
        _somgrid_acc_kernel,
        out_shape=jax.ShapeDtypeStruct((m_pad, s_pad), out_dtype),
        grid_spec=pltpu.PrefetchScalarGridSpec(
            num_scalar_prefetch=0,
            grid=(m_tiles, n_tiles, kb),
            in_specs=[pl.BlockSpec((tm, tk), lambda i, j, k: (i, k_block(j, k))),
                      pl.BlockSpec((tk, tn), lambda i, j, k: (k_block(j, k), j))],
            out_specs=pl.BlockSpec((tm, tn), lambda i, j, k: (i, j)),
            scratch_shapes=[pltpu.VMEM((tm, tn), jnp.float32)],
        ),
        compiler_params=pltpu.CompilerParams(
            dimension_semantics=("parallel", "parallel", "arbitrary"),
            vmem_limit_bytes=vmem_limit),
    )(x, w_t)


# ----------------------------- tiling helpers ------------------------------ #

def _round_up(x, m):
    return ((x + m - 1) // m) * m


def _s_tile_candidates(s_pad, max_s_tile=None):
    """Multiples of 128 dividing s_pad, descending (256/512 multiples included
    so the 256x256 MXU of v6e/v7x can be filled when S allows)."""
    q = s_pad // 128
    cands = [128 * d for d in range(q, 0, -1) if q % d == 0]
    if max_s_tile is not None:
        cap = max(128, max_s_tile)
        cands = [c for c in cands if c <= cap] or [128]
    return cands


def _sublane_multiple(*dtypes):
    m = 8
    for dt in dtypes:
        isz = jnp.dtype(dt).itemsize
        if isz == 2:
            m = max(m, 16)
        elif isz == 1:
            m = max(m, 32)
    return m


def _vmem_budget_and_limit():
    """Per-chip VMEM budget for block selection + explicit scoped limit
    (~88/104 MiB on v5e/v6e's 128 MiB, ~44/52 MiB on v7x's 64 MiB)."""
    cap = None
    try:
        cap = int(getattr(pltpu.get_tpu_info(), "vmem_capacity_bytes", 0)) or None
    except Exception:
        cap = None
    if cap is None:
        cap = 64 << 20                      # conservative fallback (v7x floor)
    budget = max(32 << 20, cap * 11 // 16)
    limit = max(budget + (8 << 20), cap * 13 // 16)
    return int(budget), int(limit)


def _choose_tiles(m_pad, s_pad, band, in_isz, out_isz, sub_mult, budget,
                  max_s_tile=None):
    """Pick (tm, tn, tk, kb) minimizing a simple HBM-traffic + MXU-time model.
    The model prefers: fully resident W_T with a single M tile, then
    single-M-tile band-sparse S tiling, then tiled M (W_T streamed per M tile)."""
    best_key, best = None, None
    for tk in _s_tile_candidates(s_pad, max_s_tile):
        for tn in _s_tile_candidates(s_pad, max_s_tile):
            k_tiles, n_tiles = s_pad // tk, s_pad // tn
            kb = 1 if k_tiles == 1 else min(k_tiles, (tn - 1 + 2 * band) // tk + 2)
            # double-buffered x + W_T blocks, double-buffered out block, f32 acc
            fixed = 2 * tk * tn * in_isz
            per_tm = 2 * tk * in_isz + 2 * tn * out_isz + (0 if kb == 1 else tn * 4)
            tm_max = (budget - fixed) // per_tm
            if tm_max < sub_mult:
                continue
            if m_pad <= tm_max:
                tm = m_pad                  # single M tile: W_T streamed only once
            else:
                tm = int(tm_max)
                for g in (512, 256, 128, sub_mult):
                    if tm >= g:
                        tm = (tm // g) * g
                        break
            m_tiles = -(-m_pad // tm)
            m_rows = m_tiles * tm
            # HBM traffic model (matches the grid orderings used in somgrid_blur)
            if kb == 1:                     # j-outer, no-accumulator grid
                wt_fetch = n_tiles
                x_fetch = n_tiles * m_tiles
            else:                           # (m, n, k) banded accumulator grid
                wt_fetch = m_tiles * n_tiles * kb
                x_fetch = m_tiles * n_tiles * kb
            bytes_moved = (wt_fetch * tk * tn * in_isz
                           + x_fetch * tm * tk * in_isz
                           + m_rows * s_pad * out_isz)
            flops = 2.0 * m_rows * n_tiles * tn * kb * tk
            mxu_row_eff = max(min(tm, 256) / 256.0, 1.0 / 16.0)
            score = bytes_moved + flops / (600.0 * mxu_row_eff)
            key = (score, -tk, -tn, -tm)
            if best_key is None or key < best_key:
                best_key, best = key, (tm, tn, tk, kb)
    assert best is not None, "no feasible tile configuration"
    return best


# ------------------------------ JAX-side glue ------------------------------ #

def gaussian_kernel_init(kernel_size):
    range_ = kernel_size // 2
    r = np.arange(-range_, range_ + 1, dtype=np.float32)
    k1 = np.exp(-(r ** 2))
    return np.outer(k1, k1).astype(np.float32)


def build_wt_base(kernel_init, h, w, pad, s_pad):
    """Banded base matrix W0 with W0[q, p] = kernel_init[q_i-p_i+pad, q_j-p_j+pad]
    (0 outside the kernel / in the S padding).  Then
    (cb_flat @ (W0**p * s))[m, p] == conv2d(cb, kernel_t, padding='same')[m, p]."""
    kh, kw = kernel_init.shape
    s = h * w
    ii, jj = np.meshgrid(np.arange(h), np.arange(w), indexing="ij")
    ii = ii.reshape(-1)
    jj = jj.reshape(-1)
    ki = ii[:, None] - ii[None, :] + pad      # rows = q (contraction), cols = p
    kj = jj[:, None] - jj[None, :] + pad
    valid = (ki >= 0) & (ki < kh) & (kj >= 0) & (kj < kw)
    vals = np.where(valid,
                    kernel_init[np.clip(ki, 0, kh - 1), np.clip(kj, 0, kw - 1)],
                    0.0).astype(np.float32)
    base = np.zeros((s_pad, s_pad), np.float32)
    base[:s, :s] = vals
    return base


class SOMGrid:
    """JAX/Pallas port of som_quantize.utils.SOMGrid (forward pass)."""

    def __init__(self, height, width, neighbor_distance=6,
                 kernel_type="gaussian", time_constant=0.0005, normalize=False,
                 compute_dtype=jnp.bfloat16, max_s_tile=None):
        # TODO(synk): neighbor_distance == 0 (tuple kernel_size/padding) path not ported.
        assert neighbor_distance != 0
        self.height = height
        self.width = width
        self.size = height * width
        self.size_pad = _round_up(self.size, 128)       # lane-dense output
        self.normalize = normalize
        self.t = 0
        self.time_constant = time_constant
        self.kernel_type = kernel_type
        self.neighbor_distance = neighbor_distance
        self.kernel_size = 2 * neighbor_distance + 1
        self.padding = neighbor_distance
        self.band = self.padding * (width + 1)          # flat-index band half-width
        self.compute_dtype = jnp.dtype(compute_dtype)
        self.max_s_tile = max_s_tile
        self._budget, self._vmem_limit = _vmem_budget_and_limit()

        if kernel_type == "gaussian":
            kernel_init = gaussian_kernel_init(self.kernel_size)
        elif kernel_type == "hard":
            kernel_init = np.ones((self.kernel_size, self.kernel_size), np.float32)
        else:
            raise ValueError("kernel_type must be gaussian or hard")
        if self.normalize:
            kernel_init = kernel_init / kernel_init.sum()
        self.kernel_init = kernel_init
        self.kernel = kernel_init

        # Banded base matrix: built once on host, resident on device in f32.
        self._wt_base = jnp.asarray(build_wt_base(
            kernel_init, height, width, self.padding, self.size_pad))
        # Fused per-step transform W_T = W0**p * s (one compile, cached per t).
        cdt = self.compute_dtype
        self._wt_transform = jax.jit(
            lambda base, p, s: (jnp.power(base, p) * s).astype(cdt))
        self._wt_cache = None
        self._wt_cache_key = None

    # stateful buffer update kept as host-side glue (matches torch semantics)
    def update_t(self):
        self.t += 1
        t_scalar = 1.0 + self.t * self.time_constant
        if self.kernel_type == "gaussian":
            kernel = self.kernel_init ** t_scalar
        else:
            kernel = self.kernel_init * (1.0 / t_scalar)
        if self.normalize:
            kernel = kernel / kernel.sum()
        self.kernel = kernel

    def _current_pow_scale(self):
        """(p, s) such that kernel(t) == kernel_init**p * s elementwise,
        hence W_T(t) == W0**p * s."""
        t_scalar = 1.0 + self.t * self.time_constant
        if self.kernel_type == "gaussian":
            p = float(t_scalar)
            raw = self.kernel_init ** t_scalar
            s = 1.0 / float(raw.sum()) if self.normalize else 1.0
        else:
            p = 1.0
            s = 1.0 / t_scalar
            if self.normalize:
                s = s / float((self.kernel_init * s).sum())
        return p, s

    def _get_wt(self):
        """Device-resident W_T for the current t; one fused elementwise pow/scale
        over the cached base when t changed (no gather, no host round trip)."""
        if self._wt_cache is None or self._wt_cache_key != self.t:
            p, s = self._current_pow_scale()
            if p == 1.0 and s == 1.0:
                w = self._wt_base.astype(self.compute_dtype)
            else:
                w = self._wt_transform(self._wt_base, p, s)
            self._wt_cache = w
            self._wt_cache_key = self.t
        return self._wt_cache

    def __call__(self, cb_onehot, update_t=True):
        # TODO(synk): hard one-hot fast path (row gather of W_T) not implemented;
        # the module admits soft assignments so the general matmul is used.
        cb_onehot = jnp.asarray(cb_onehot)
        b, dim, size = cb_onehot.shape
        assert size == self.size

        out_dtype = (jnp.dtype(cb_onehot.dtype)
                     if jnp.issubdtype(cb_onehot.dtype, jnp.floating)
                     else jnp.dtype(jnp.float32))
        sub_mult = _sublane_multiple(self.compute_dtype, out_dtype)
        m = b * dim
        m_pad = _round_up(m, sub_mult)
        tm, tn, tk, kb = _choose_tiles(
            m_pad, self.size_pad, self.band,
            self.compute_dtype.itemsize, out_dtype.itemsize,
            sub_mult, self._budget, self.max_s_tile)
        m_rows = _round_up(m, tm)

        w_t = self._get_wt()
        x = cb_onehot.reshape(m, size).astype(self.compute_dtype)
        padded = (m_rows != m) or (self.size_pad != size)
        if padded:
            x = jnp.pad(x, ((0, m_rows - m), (0, self.size_pad - size)))

        out = somgrid_blur(x, w_t, tm=tm, tn=tn, tk=tk, kb=kb, band=self.band,
                           out_dtype=out_dtype, vmem_limit=self._vmem_limit)
        if padded:
            out = out[:m, :size]
        out = out.reshape(b, dim, size)

        if update_t:
            self.update_t()
        return out


# ------------------------------ reference --------------------------------- #

def ref_forward(cb, kernel, h, w, pad):
    """Pure numpy depthwise 'same' conv2d (cross-correlation), per PyTorch."""
    cb = np.asarray(cb, dtype=np.float32)
    B, D, S = cb.shape
    x = cb.reshape(B, D, h, w)
    K = kernel.shape[0]
    xp = np.pad(x, ((0, 0), (0, 0), (pad, pad), (pad, pad)))
    out = np.zeros((B, D, h, w), np.float32)
    for di in range(K):
        for dj in range(K):
            out += kernel[di, dj] * xp[:, :, di:di + h, dj:dj + w]
    return out.reshape(B, D, h * w)


if __name__ == "__main__":
    key = jax.random.PRNGKey(0)
    k1, k2, k3 = jax.random.split(key, 3)

    # --- test 1: hard one-hot, 8x8 SOM -> fully resident W_T, no-acc kernel ---
    batch, dim, h, w = 2, 16, 8, 8
    size = h * w
    idx = jax.random.randint(k1, (batch, dim), 0, size)
    cb_onehot = jax.nn.one_hot(idx, size, dtype=jnp.float32)

    som = SOMGrid(height=h, width=w, neighbor_distance=6,
                  kernel_type="gaussian", time_constant=0.0005, normalize=False)
    kernel_used = som.kernel.copy()
    out = jax.block_until_ready(som(cb_onehot, update_t=True))
    assert out.shape == (batch, dim, size) and out.dtype == cb_onehot.dtype
    ref = ref_forward(cb_onehot, kernel_used, h, w, som.padding)
    np.testing.assert_allclose(np.asarray(out, np.float32), ref, rtol=2e-2, atol=1e-6)
    assert som.t == 1                       # update_t side effect after forward

    # second forward: kernel changed after update_t -> W_T re-derived on device
    kernel_used = som.kernel.copy()
    out2 = jax.block_until_ready(som(cb_onehot, update_t=False))
    ref2 = ref_forward(cb_onehot, kernel_used, h, w, som.padding)
    np.testing.assert_allclose(np.asarray(out2, np.float32), ref2, rtol=2e-2, atol=1e-6)

    # --- test 2: soft assignments, 16x16 SOM, forced tiling -> accumulator path
    h2, w2, dim2 = 16, 16, 32
    size2 = h2 * w2
    cb_soft = jax.random.uniform(k2, (batch, dim2, size2), dtype=jnp.float32)
    som2 = SOMGrid(height=h2, width=w2, neighbor_distance=6,
                   kernel_type="hard", normalize=True, max_s_tile=128)
    out3 = jax.block_until_ready(som2(cb_soft, update_t=True))
    ref3 = ref_forward(cb_soft, som2.kernel_init, h2, w2, som2.padding)
    np.testing.assert_allclose(np.asarray(out3, np.float32), ref3, rtol=2e-2, atol=1e-4)

    # --- test 3: 32x32 SOM, small neighborhood -> band-sparse K sweep ---------
    h3, w3, dim3 = 32, 32, 8
    size3 = h3 * w3
    cb_soft3 = jax.random.uniform(k3, (batch, dim3, size3), dtype=jnp.float32)
    som3 = SOMGrid(height=h3, width=w3, neighbor_distance=2,
                   kernel_type="gaussian", normalize=False, max_s_tile=128)
    kernel_used3 = som3.kernel.copy()
    out4 = jax.block_until_ready(som3(cb_soft3, update_t=True))
    ref4 = ref_forward(cb_soft3, kernel_used3, h3, w3, som3.padding)
    np.testing.assert_allclose(np.asarray(out4, np.float32), ref4, rtol=2e-2, atol=1e-4)

    print("KERNEL_OK")
</pallas_src>

<mosaic_0001>
module attributes {stable_mosaic.version = 11 : i64} {
  func.func @_somgrid_noacc_kernel(%arg0: i32, %arg1: i32, %arg2: memref<32x128xbf16, #tpu.memory_space<vmem>>, %arg3: memref<128x128xbf16, #tpu.memory_space<vmem>>, %arg4: memref<32x128xf32, #tpu.memory_space<vmem>>) attributes {dimension_semantics = [#tpu.dimension_semantics<parallel>, #tpu.dimension_semantics<parallel>], iteration_bounds = array<i64: 1, 1>, scalar_prefetch = 0 : i64, scratch_operands = 0 : i64, tpu.core_type = #tpu.core_type<tc>, window_params = [{transform_indices = @transform_0, window_bounds = array<i64: 32, 128>}, {transform_indices = @transform_1, window_bounds = array<i64: 128, 128>}, {transform_indices = @transform_2, window_bounds = array<i64: 32, 128>}]} {
    %c0 = arith.constant 0 : index
    %c0_0 = arith.constant 0 : index
    %0 = vector.load %arg2[%c0, %c0_0] : memref<32x128xbf16, #tpu.memory_space<vmem>>, vector<32x128xbf16>
    %c0_1 = arith.constant 0 : index
    %c0_2 = arith.constant 0 : index
    %1 = vector.load %arg3[%c0_1, %c0_2] : memref<128x128xbf16, #tpu.memory_space<vmem>>, vector<128x128xbf16>
    %cst = arith.constant dense<0.000000e+00> : vector<32x128xf32>
    %2 = tpu.matmul %0, %1, %cst {dimension_numbers = #tpu.dot_dimension_numbers<[1], [0], [0], [1], [0, 0, 1, 1], [], []>} : vector<32x128xbf16>, vector<128x128xbf16>, vector<32x128xf32> -> vector<32x128xf32>
    %c0_3 = arith.constant 0 : index
    %c0_4 = arith.constant 0 : index
    %3 = vector.load %arg4[%c0_3, %c0_4] : memref<32x128xf32, #tpu.memory_space<vmem>>, vector<32x128xf32>
    tpu.vector_store %arg4[%c0_3, %c0_4], %2 {strides = array<i32>} : memref<32x128xf32, #tpu.memory_space<vmem>>, vector<32x128xf32>,
    return
  }
  func.func @transform_0(%arg0: i32, %arg1: i32) -> (i32, i32) {
    %c0_i32 = arith.constant 0 : i32
    %c0_i32_0 = arith.constant 0 : i32
    return %arg1, %c0_i32 : i32, i32
  }
  func.func @transform_1(%arg0: i32, %arg1: i32) -> (i32, i32) {
    %c0_i32 = arith.constant 0 : i32
    %c0_i32_0 = arith.constant 0 : i32
    return %c0_i32, %arg0 : i32, i32
  }
  func.func @transform_2(%arg0: i32, %arg1: i32) -> (i32, i32) {
    %c0_i32 = arith.constant 0 : i32
    return %arg1, %arg0 : i32, i32
  }
}

</mosaic_0001>

<bundles_post_ra>
// kernel: somgrid_blur.1
= control target key start
LH: loop header
LB: loop body
LE: loop exit
PB: predicated region body
PF: predicated region fallthrough
CT: control target
= control target key end

     0   :  { %7 = vsyncpa [#allocation3], 0  ;;  %s379_s0 = inlined_call_operand.hbm [shape: bf16[32,128], index: 0, kind: input, shape index: {}]   ;;  %s380_s1 = inlined_call_operand.hbm [shape: bf16[128,128], index: 1, kind: input, shape index: {}]   ;;  %s381_s2 = inlined_call_operand.hbm [shape: f32[32,128], index: 2, kind: output, shape index: {}]  }
   0x1   :  { %8 = vsyncpa [#allocation6], 0 }
   0x2   :  { %9 = vsyncpa [#allocation4], 0  ;;  %s321_s9 = smov [#allocation2]   ;;  %s249_s13 = scalar_lea.hbm %s379_s0, 256 }
   0x3   :  { %s15_s10 = sshll.u32 %s321_s9, 4  ;;  %p250_p0 = scmp.ne.s32.totalorder %s379_s0, %s249_s13  ;;  %s16_s10 = int_to_ptr.vmem [resolvable:$true] %s15_s10 }
   0x4   :  { %p253_p1 = scmp.lt.u32.totalorder %s249_s13, %s379_s0 }
   0x6   :  { %p255_p2 = pnand %p253_p1, %p250_p0 }
   0x8   :  { %258 = shalt.err (!%p255_p2)
}
   0x9   :  { %s259_s18 = scalar_lea.vmem %s16_s10, 256  ;;  %p264_p4 = scmp.lt.s32.totalorder %s16_s10, %s16_s10 }
   0xa   :  { %p260_p3 = scmp.ne.s32.totalorder %s16_s10, %s259_s18  ;;  %p265_p5 = scmp.lt.s32.totalorder %s259_s18, %s259_s18 }
   0xc   :  { %p266_p6 = por %p265_p5, %p264_p4 }
   0xe   :  { %p267_p7 = pnand %p266_p6, %p260_p3 }
  0x10   :  { %270 = shalt.err (!%p267_p7)
}
  0x11   :  { %s322_s19 = smov 64   ;;  %s323_s20 = smov 4  }
  0x12   :  { %21 = dma.hbm_to_vmem [thread:$0]  %s379_s0, 256, %s16_s10, [#allocation3], %s322_s19, %s322_s19, %s323_s20  }
  0x13   :  { %s324_s23 = smov [#allocation5]   ;;  %s271_s27 = scalar_lea.hbm %s380_s1, 1024 }
  0x14   :  { %s27_s24 = sshll.u32 %s324_s23, 4  ;;  %p272_p8 = scmp.ne.s32.totalorder %s380_s1, %s271_s27  ;;  %s28_s24 = int_to_ptr.vmem [resolvable:$true] %s27_s24 }
  0x15   :  { %p275_p9 = scmp.lt.u32.totalorder %s271_s27, %s380_s1 }
  0x17   :  { %p277_p10 = pnand %p275_p9, %p272_p8 }
  0x19   :  { %280 = shalt.err (!%p277_p10)
}
  0x1a   :  { %s281_s4 = scalar_lea.vmem %s28_s24, 1024  ;;  %p286_p12 = scmp.lt.s32.totalorder %s28_s24, %s28_s24 }
  0x1b   :  { %p282_p11 = scmp.ne.s32.totalorder %s28_s24, %s281_s4  ;;  %p287_p13 = scmp.lt.s32.totalorder %s281_s4, %s281_s4 }
  0x1d   :  { %p288_p0 = por %p287_p13, %p286_p12 }
  0x1f   :  { %p289_p1 = pnand %p288_p0, %p282_p11 }
  0x21   :  { %292 = shalt.err (!%p289_p1)
}
  0x22   :  { %33 = dma.hbm_to_vmem [thread:$0]  %s380_s1, 1024, %s28_s24, [#allocation6], %s322_s19, %s322_s19, %s323_s20  }
  0x23   :  { %315 = dma.done.wait [#allocation3], 256  }
  0x24   :  { %316 = vsyncadd [#allocation3], 4294967040 }
  0x25   :  { %317 = dma.done.wait [#allocation6], 1024  }
  0x26   :  { %318 = vsyncadd [#allocation6], 4294966272  ;;  %v239_v0 = vld [vmem:[#allocation5] sm:$0xff]   ;;  %v240_v1 = vld [vmem:[#allocation5 + $0x8] sm:$0xff]   ;;  %s325_s1 = smov [#allocation7]  }
  0x27   :  { %212 = vmatprep.subr.bf16.mxu0 %v239_v0  ;;  %v241_v2 = vld [vmem:[#allocation5 + $0x10] sm:$0xff]   ;;  %v242_v3 = vld [vmem:[#allocation5 + $0x18] sm:$0xff]   ;;  %v243_v5 = vld [vmem:[#allocation5 + $0x20] sm:$0xff]   ;;  %s179_s6 = sshll.u32 %s325_s1, 4  ;;  %s180_s6 = int_to_ptr.vmem [resolvable:$true] %s179_s6 }
  0x28   :  { %213 = vmatpush3.bf16.msra.mxu0 %v239_v0  ;;  %v247_v4 = vld [vmem:[#allocation2] sm:$0xff]   ;;  %v244_v6 = vld [vmem:[#allocation5 + $0x28] sm:$0xff]   ;;  %v246_v8 = vld [vmem:[#allocation5 + $0x38] sm:$0xff]   ;;  %s293_s7 = scalar_lea.vmem %s180_s6, 512  ;;  %p298_p3 = scmp.lt.s32.totalorder %s180_s6, %s180_s6 }
  0x29   :  { %214 = vmatprep.subr.bf16.mxu0 %v240_v1  ;;  %228 = vmatprep.mubr.bf16.mxu0 %v247_v4  ;;  %v245_v7 = vld [vmem:[#allocation5 + $0x30] sm:$0xff]   ;;  %v248_v9 = vld [vmem:[#allocation2 + $0x8] sm:$0xff]   ;;  %p294_p2 = scmp.ne.s32.totalorder %s180_s6, %s293_s7  ;;  %p299_p4 = scmp.lt.s32.totalorder %s293_s7, %s293_s7 }
  0x2b   :  { %p300_p5 = por %p299_p4, %p298_p3 }
  0x2c   :  { %215 = vmatpush3.bf16.msra.mxu0 %v240_v1 }
  0x2d   :  { %216 = vmatprep.subr.bf16.mxu0 %v241_v2  ;;  %p301_p6 = pnand %p300_p5, %p294_p2 }
  0x30   :  { %217 = vmatpush3.bf16.msra.mxu0 %v241_v2 }
  0x31   :  { %218 = vmatprep.subr.bf16.mxu0 %v242_v3 }
  0x34   :  { %219 = vmatpush3.bf16.msra.mxu0 %v242_v3 }
  0x35   :  { %220 = vmatprep.subr.bf16.mxu0 %v243_v5 }
  0x38   :  { %221 = vmatpush3.bf16.msra.mxu0 %v243_v5 }
  0x39   :  { %222 = vmatprep.subr.bf16.mxu0 %v244_v6 }
  0x3c   :  { %223 = vmatpush3.bf16.msra.mxu0 %v244_v6 }
  0x3d   :  { %224 = vmatprep.subr.bf16.mxu0 %v245_v7 }
  0x40   :  { %225 = vmatpush3.bf16.msra.mxu0 %v245_v7 }
  0x41   :  { %226 = vmatprep.subr.bf16.mxu0 %v246_v8 }
  0x44   :  { %227 = vmatpush3.bf16.msra.mxu0 %v246_v8 }
  0x47   :  { %229 = vmatmul.mubr.bf16.vlgmr.msra.gmra.mrb[0].mxu0 %v248_v9 }
 0x11a   :  { %v230_v10 = vpop.f32.mrb[0].mxu0 }
 0x11b   :  { %172 = vst [vmem:[#allocation7 + $0x10] sm:$0xff] %v230_v10  ;;  %v155_v11 = vpop.f32.mrb[1].mxu0 }
 0x11c   :  { %170 = vst [vmem:[#allocation7] sm:$0xff] %v155_v11  ;;  %v231_v12 = vpop.f32.mrb[2].mxu0 }
 0x11d   :  { %173 = vst [vmem:[#allocation7 + $0x18] sm:$0xff] %v231_v12  ;;  %v158_v13 = vpop.f32.mrb[3].mxu0 }
 0x11e   :  { %171 = vst [vmem:[#allocation7 + $0x8] sm:$0xff] %v158_v13 }
 0x11f   :  { %304 = shalt.err (!%p301_p6)
}
 0x120   :  { %s305_s10 = scalar_lea.hbm %s381_s2, 512 }
 0x121   :  { %p306_p7 = scmp.ne.s32.totalorder %s381_s2, %s305_s10  ;;  %p309_p8 = scmp.lt.u32.totalorder %s305_s10, %s381_s2 }
 0x123   :  { %p311_p9 = pnand %p309_p8, %p306_p7 }
 0x125   :  { %314 = shalt.err (!%p311_p9)
}
 0x126   :  { %s326_s15 = smov 128   ;;  %s327_s16 = smov 8  }
 0x127   :  { %185 = dma.vmem_to_hbm [thread:$0]  %s180_s6, 512, %s381_s2, [#allocation4], %s326_s15, %s326_s15, %s327_s16  }
 0x128   :  { %319 = dma.done.wait [#allocation4], 512  }
 0x129   :  { %320 = vsyncadd [#allocation4], 4294966784 }
 0x12a   :  { %189 = vsyncpa [#allocation3], 1 }
 0x12b   :  { %190 = vsyncpa [#allocation6], 1 }
 0x12c   :  { %191 = vsyncpa [#allocation4], 1 }

</bundles_post_ra>
